<compile_context>
chip_gen: v7x
topology: tpu7x:2x2x1
jax: 0.10.0
libtpu: 0.0.40
codegen_flags: <defaults>
</compile_context>

<pallas_src>
import functools

import jax
import jax.numpy as jnp
from jax.experimental import pallas as pl
from jax.experimental.pallas import tpu as pltpu

D_IN = 128  # fixed by the module: nn.Linear(128, nclass)

_VMEM_BUDGET = 20 * 1024 * 1024  # target live bytes per grid step


def _round_up(x, m):
    return (x + m - 1) // m * m


# --------------------------------------------------------------------------
# Kernels
# --------------------------------------------------------------------------
def _mean_kernel(x_ref, w_ref, b_ref, out_ref, acc_ref, *, t_total, t_chunk, inv_t):
    # x_ref: (Bb, Tc, 128)  w_ref: (128, C)  b_ref: (1, C)
    # out_ref: (Bb, C)      acc_ref: (Bb, C) f32 scratch (resident across T axis)
    k = pl.program_id(1)

    @pl.when(k == 0)
    def _():
        acc_ref[...] = jnp.zeros_like(acc_ref)

    Bb, Tc, D = x_ref.shape
    x2 = x_ref[...].reshape(Bb * Tc, D)                       # tile-aligned merge
    h = jnp.dot(x2, w_ref[...], preferred_element_type=jnp.float32) + b_ref[...]
    s = jax.nn.sigmoid(h).reshape(Bb, Tc, -1)                 # (Bb, Tc, C), f32

    if t_total % t_chunk != 0:
        # Ragged last T chunk: zero out rows past the true sequence length so
        # garbage (masked edge reads) never enters the accumulator.
        t_idx = jax.lax.broadcasted_iota(jnp.int32, (Tc, 1), 0)
        valid = (t_idx + k * t_chunk) < t_total               # (Tc, 1)
        s = jnp.where(valid, s, 0.0)

    acc_ref[...] += jnp.sum(s, axis=1)

    @pl.when(k == pl.num_programs(1) - 1)
    def _():
        out_ref[...] = (acc_ref[...] * inv_t).astype(out_ref.dtype)


def _seq_kernel(x_ref, w_ref, b_ref, out_ref):
    # x_ref: (Bb, Tc, 128)  w_ref: (128, C)  b_ref: (1, C)  out_ref: (Bb, Tc, C)
    Bb, Tc, D = x_ref.shape
    x2 = x_ref[...].reshape(Bb * Tc, D)
    h = jnp.dot(x2, w_ref[...], preferred_element_type=jnp.float32) + b_ref[...]
    out_ref[...] = jax.nn.sigmoid(h).reshape(Bb, Tc, -1).astype(out_ref.dtype)


# --------------------------------------------------------------------------
# Tile selection (VMEM-budgeted over Bb, Tc, C)
# --------------------------------------------------------------------------
def _live_bytes(Bb, Tc, C, itemsize, seq):
    sub = max(8, 32 // itemsize)
    Cl = _round_up(C, 128)            # lane-padded width as held in VMEM/vregs
    Tcl = _round_up(Tc, sub)
    Bbl = _round_up(Bb, 8)
    x_blk = 2 * Bb * Tcl * D_IN * itemsize          # double-buffered x block
    w_b = 2 * (D_IN * Cl + 8 * Cl) * 4              # weight + bias (resident)
    interm = Bb * Tcl * Cl * 4                      # f32 logits/sigmoid temporaries
    if seq:
        out_blk = 2 * Bb * Tcl * Cl * itemsize
        acc = 0
    else:
        out_blk = 2 * Bbl * Cl * itemsize
        acc = Bbl * Cl * 4
    return x_blk + w_b + interm + out_blk + acc


def _pick_tiles(B, T, C, itemsize, seq):
    sub = max(8, 32 // itemsize)

    # Batch-block candidates: multiples of 8 (BlockSpec sublane rule for the
    # (Bb, C) mean output block) or B itself when that is legal.
    if B < 8:
        bb_cands = [B]
    else:
        bb_cands = [c for c in (128, 64, 32, 16, 8) if c <= B]
        if B % 8 == 0 and B <= 128 and B not in bb_cands:
            bb_cands.insert(0, B)
        if B >= 16:
            # Keep >= 2 batch blocks: v7x megacore work + pipelining.
            filtered = [c for c in bb_cands if 2 * c <= B]
            if filtered:
                bb_cands = filtered

    # T-chunk candidates: multiples of the sublane tile -> tile-aligned reshape.
    if T <= sub:
        tc_cands = [T]
    else:
        tc_cands = sorted(
            {c for c in (1024, 512, 256, 128, 64, 32, 16, sub) if c <= T}
            | {(T // sub) * sub},
            reverse=True,
        )

    best = None
    for bb in bb_cands:
        for tc in tc_cands:
            if _live_bytes(bb, tc, C, itemsize, seq) <= _VMEM_BUDGET:
                if best is None or bb * tc > best[0] * best[1]:
                    best = (bb, tc)
                break  # tc_cands descending: first fit is the largest for this bb
    if best is None:
        best = (bb_cands[-1], tc_cands[-1])
    return best


# --------------------------------------------------------------------------
# Wrapper
# --------------------------------------------------------------------------
@functools.partial(jax.jit, static_argnames=("output_sequence",))
def linear_classifier_forward(x, w, b, output_sequence=False):
    """x: (B, T, 128), w: (128, C), b: (1, C) -> (B, C) or (B, T, C)."""
    B, T, D = x.shape
    assert D == D_IN
    C = w.shape[1]
    itemsize = x.dtype.itemsize

    Bb, Tc = _pick_tiles(B, T, C, itemsize, output_sequence)
    grid = (pl.cdiv(B, Bb), pl.cdiv(T, Tc))

    x_spec = pl.BlockSpec((Bb, Tc, D_IN), lambda i, k: (i, k, 0))
    w_spec = pl.BlockSpec((D_IN, C), lambda i, k: (0, 0))   # resident, fetched once
    b_spec = pl.BlockSpec((1, C), lambda i, k: (0, 0))

    if output_sequence:
        kernel = _seq_kernel
        out_shape = jax.ShapeDtypeStruct((B, T, C), x.dtype)
        out_spec = pl.BlockSpec((Bb, Tc, C), lambda i, k: (i, k, 0))
        scratch_shapes = []
        semantics = ("parallel", "parallel")
        out_bytes = B * T * C * itemsize
    else:
        kernel = functools.partial(_mean_kernel, t_total=T, t_chunk=Tc, inv_t=1.0 / T)
        out_shape = jax.ShapeDtypeStruct((B, C), x.dtype)
        out_spec = pl.BlockSpec((Bb, C), lambda i, k: (i, 0))  # resident across k
        scratch_shapes = [pltpu.VMEM((Bb, C), jnp.float32)]
        semantics = ("parallel", "arbitrary")
        out_bytes = B * C * itemsize

    est = _live_bytes(Bb, Tc, C, itemsize, output_sequence)
    vmem_limit = int(min(48 * 1024 * 1024, max(32 * 1024 * 1024, est * 3 // 2)))

    cost = pl.CostEstimate(
        flops=2 * B * T * D_IN * C,
        transcendentals=B * T * C,
        bytes_accessed=(x.size * itemsize + w.size * w.dtype.itemsize
                        + b.size * b.dtype.itemsize + out_bytes),
    )

    return pl.pallas_call(
        kernel,
        out_shape=out_shape,
        grid_spec=pltpu.PrefetchScalarGridSpec(
            num_scalar_prefetch=0,
            grid=grid,
            in_specs=[x_spec, w_spec, b_spec],
            out_specs=out_spec,
            scratch_shapes=scratch_shapes,
        ),
        compiler_params=pltpu.CompilerParams(
            dimension_semantics=semantics,
            vmem_limit_bytes=vmem_limit,
        ),
        cost_estimate=cost,
    )(x, w, b)


def init_params(key, nclass):
    """Deterministic init mimicking nn.Linear default (uniform +-1/sqrt(fan_in))."""
    kw, kb = jax.random.split(key)
    bound = 1.0 / jnp.sqrt(float(D_IN))
    w = jax.random.uniform(kw, (D_IN, nclass), jnp.float32, -bound, bound)
    b = jax.random.uniform(kb, (1, nclass), jnp.float32, -bound, bound)
    return w, b


if __name__ == "__main__":
    key = jax.random.PRNGKey(0)

    def ref_forward(x, w, b, output_sequence):
        B, T, _ = x.shape
        s = jax.nn.sigmoid(x.reshape(B * T, D_IN) @ w + b).reshape(B, T, -1)
        return s if output_sequence else s.mean(axis=1)

    # (B, T, nclass): second config exercises ragged batch/T blocks + masking.
    for (B, T, NCLASS) in [(2, 8, 10), (10, 12, 5)]:
        k_x, k_p, key = jax.random.split(key, 3)
        x = jax.random.normal(k_x, (B, T, D_IN), jnp.float32)
        w, b = init_params(k_p, NCLASS)

        out_mean = jax.block_until_ready(
            linear_classifier_forward(x, w, b, output_sequence=False))
        out_seq = jax.block_until_ready(
            linear_classifier_forward(x, w, b, output_sequence=True))

        ref_mean = ref_forward(x, w, b, False)
        ref_seq = ref_forward(x, w, b, True)

        assert out_mean.shape == (B, NCLASS)
        assert out_seq.shape == (B, T, NCLASS)
        assert jnp.allclose(out_mean, ref_mean, atol=1e-5, rtol=1e-5)
        assert jnp.allclose(out_seq, ref_seq, atol=1e-5, rtol=1e-5)

    print("KERNEL_OK")
</pallas_src>

<mosaic_0001>
module attributes {stable_mosaic.version = 11 : i64} {
  func.func @_mean_kernel(%arg0: i32, %arg1: i32, %arg2: memref<2x8x128xf32, #tpu.memory_space<vmem>>, %arg3: memref<128x10xf32, #tpu.memory_space<vmem>>, %arg4: memref<1x10xf32, #tpu.memory_space<vmem>>, %arg5: memref<2x10xf32, #tpu.memory_space<vmem>>, %arg6: memref<2x10xf32, #tpu.memory_space<vmem>>) attributes {dimension_semantics = [#tpu.dimension_semantics<parallel>, #tpu.dimension_semantics<arbitrary>], iteration_bounds = array<i64: 1, 1>, scalar_prefetch = 0 : i64, scratch_operands = 1 : i64, tpu.core_type = #tpu.core_type<tc>, window_params = [{transform_indices = @transform_0, window_bounds = array<i64: 2, 8, 128>}, {pipeline_mode = #tpu.pipeline_mode<synchronous>, transform_indices = @transform_1, window_bounds = array<i64: 128, 10>}, {pipeline_mode = #tpu.pipeline_mode<synchronous>, transform_indices = @transform_2, window_bounds = array<i64: 1, 10>}, {transform_indices = @transform_3, window_bounds = array<i64: 2, 10>}]} {
    %c0_i32 = arith.constant 0 : i32
    %0 = arith.cmpi eq, %arg1, %c0_i32 : i32
    %1 = arith.extui %0 : i1 to i32
    %c0_i32_0 = arith.constant 0 : i32
    %2 = arith.cmpi ne, %1, %c0_i32_0 : i32
    scf.if %2 {
      %cst_15 = arith.constant 0.000000e+00 : f32
      %23 = vector.broadcast %cst_15 : f32 to vector<2x10xf32>
      %c0_16 = arith.constant 0 : index
      %c0_17 = arith.constant 0 : index
      %24 = vector.load %arg6[%c0_16, %c0_17] : memref<2x10xf32, #tpu.memory_space<vmem>>, vector<2x10xf32>
      tpu.vector_store %arg6[%c0_16, %c0_17], %23 {strides = array<i32>} : memref<2x10xf32, #tpu.memory_space<vmem>>, vector<2x10xf32>,
    } else {
    }
    %c0 = arith.constant 0 : index
    %c0_1 = arith.constant 0 : index
    %c0_2 = arith.constant 0 : index
    %3 = vector.load %arg2[%c0, %c0_1, %c0_2] : memref<2x8x128xf32, #tpu.memory_space<vmem>>, vector<2x8x128xf32>
    %4 = vector.shape_cast %3 : vector<2x8x128xf32> to vector<16x128xf32>
    %c0_3 = arith.constant 0 : index
    %c0_4 = arith.constant 0 : index
    %5 = vector.load %arg3[%c0_3, %c0_4] : memref<128x10xf32, #tpu.memory_space<vmem>>, vector<128x10xf32>
    %cst = arith.constant dense<0.000000e+00> : vector<16x10xf32>
    %6 = tpu.matmul %4, %5, %cst {dimension_numbers = #tpu.dot_dimension_numbers<[1], [0], [0], [1], [0, 0, 1, 1], [], []>} : vector<16x128xf32>, vector<128x10xf32>, vector<16x10xf32> -> vector<16x10xf32>
    %c0_5 = arith.constant 0 : index
    %c0_6 = arith.constant 0 : index
    %7 = vector.load %arg4[%c0_5, %c0_6] : memref<1x10xf32, #tpu.memory_space<vmem>>, vector<1x10xf32>
    %8 = vector.broadcast %7 : vector<1x10xf32> to vector<16x10xf32>
    %9 = arith.addf %6, %8 : vector<16x10xf32>
    %10 = arith.negf %9 : vector<16x10xf32>
    %11 = math.exp %10 : vector<16x10xf32>
    %cst_7 = arith.constant 1.000000e+00 : f32
    %12 = vector.broadcast %cst_7 : f32 to vector<16x10xf32>
    %13 = arith.addf %12, %11 : vector<16x10xf32>
    %14 = arith.divf %12, %13 : vector<16x10xf32>
    %15 = vector.shape_cast %14 : vector<16x10xf32> to vector<2x8x10xf32>
    %c0_8 = arith.constant 0 : index
    %c0_9 = arith.constant 0 : index
    %16 = vector.load %arg6[%c0_8, %c0_9] : memref<2x10xf32, #tpu.memory_space<vmem>>, vector<2x10xf32>
    %cst_10 = arith.constant dense<0.000000e+00> : vector<2x10xf32>
    %17 = vector.multi_reduction <add>, %15, %cst_10 [1] : vector<2x8x10xf32> to vector<2x10xf32>
    %18 = arith.addf %16, %17 : vector<2x10xf32>
    %c0_11 = arith.constant 0 : index
    %c0_12 = arith.constant 0 : index
    %19 = vector.load %arg6[%c0_11, %c0_12] : memref<2x10xf32, #tpu.memory_space<vmem>>, vector<2x10xf32>
    tpu.vector_store %arg6[%c0_11, %c0_12], %18 {strides = array<i32>} : memref<2x10xf32, #tpu.memory_space<vmem>>, vector<2x10xf32>,
    %c0_i32_13 = arith.constant 0 : i32
    %20 = arith.cmpi eq, %arg1, %c0_i32_13 : i32
    %21 = arith.extui %20 : i1 to i32
    %c0_i32_14 = arith.constant 0 : i32
    %22 = arith.cmpi ne, %21, %c0_i32_14 : i32
    scf.if %22 {
      %c0_15 = arith.constant 0 : index
      %c0_16 = arith.constant 0 : index
      %23 = vector.load %arg6[%c0_15, %c0_16] : memref<2x10xf32, #tpu.memory_space<vmem>>, vector<2x10xf32>
      %cst_17 = arith.constant 1.250000e-01 : f32
      %24 = vector.broadcast %cst_17 : f32 to vector<2x10xf32>
      %25 = arith.mulf %23, %24 : vector<2x10xf32>
      %c0_18 = arith.constant 0 : index
      %c0_19 = arith.constant 0 : index
      %26 = vector.load %arg5[%c0_18, %c0_19] : memref<2x10xf32, #tpu.memory_space<vmem>>, vector<2x10xf32>
      tpu.vector_store %arg5[%c0_18, %c0_19], %25 {strides = array<i32>} : memref<2x10xf32, #tpu.memory_space<vmem>>, vector<2x10xf32>,
    } else {
    }
    return
  }
  func.func @transform_0(%arg0: i32, %arg1: i32) -> (i32, i32, i32) {
    %c0_i32 = arith.constant 0 : i32
    %c0_i32_0 = arith.constant 0 : i32
    return %arg0, %arg1, %c0_i32 : i32, i32, i32
  }
  func.func @transform_1(%arg0: i32, %arg1: i32) -> (i32, i32) {
    %c0_i32 = arith.constant 0 : i32
    %c0_i32_0 = arith.constant 0 : i32
    %c0_i32_1 = arith.constant 0 : i32
    return %c0_i32, %c0_i32_0 : i32, i32
  }
  func.func @transform_2(%arg0: i32, %arg1: i32) -> (i32, i32) {
    %c0_i32 = arith.constant 0 : i32
    %c0_i32_0 = arith.constant 0 : i32
    %c0_i32_1 = arith.constant 0 : i32
    return %c0_i32, %c0_i32_0 : i32, i32
  }
  func.func @transform_3(%arg0: i32, %arg1: i32) -> (i32, i32) {
    %c0_i32 = arith.constant 0 : i32
    %c0_i32_0 = arith.constant 0 : i32
    return %arg0, %c0_i32 : i32, i32
  }
}

</mosaic_0001>

<bundles_post_ra>
// kernel: linear_classifier_forward.1
= control target key start
LH: loop header
LB: loop body
LE: loop exit
PB: predicated region body
PF: predicated region fallthrough
CT: control target
= control target key end

     0   :  { %s393_s0 = inlined_call_operand.vmem [shape: f32[2,8,128], index: 0, kind: input, shape index: {}]   ;;  %s394_s1 = inlined_call_operand.vmem [shape: f32[128,10], index: 1, kind: input, shape index: {}]   ;;  %s395_s2 = inlined_call_operand.vmem [shape: f32[1,10], index: 2, kind: input, shape index: {}]   ;;  %s396_s3 = inlined_call_operand.hbm [shape: f32[2,10], index: 3, kind: output, shape index: {}]  }
   0x1   :  { %v23_v0 = vld [vmem:[%s394_s1] sm:$0xff]  ;;  %v24_v1 = vld [vmem:[%s394_s1 + $0x8] sm:$0xff]  ;;  %v25_v2 = vld [vmem:[%s394_s1 + $0x10] sm:$0xff] }
   0x2   :  { %v233_v3 = vpack.c.bf16 %v24_v1, %v23_v0  ;;  %v26_v4 = vld [vmem:[%s394_s1 + $0x18] sm:$0xff]  ;;  %v27_v6 = vld [vmem:[%s394_s1 + $0x20] sm:$0xff]  ;;  %v28_v7 = vld [vmem:[%s394_s1 + $0x28] sm:$0xff] }
   0x3   :  { %v237_v5 = vpack.c.bf16 %v26_v4, %v25_v2  ;;  %v241_v8 = vpack.c.bf16 %v28_v7, %v27_v6  ;;  %v21_v9 = vld [vmem:[%s393_s0] sm:$0xff]  ;;  %v29_v10 = vld [vmem:[%s394_s1 + $0x30] sm:$0xff]  ;;  %v30_v11 = vld [vmem:[%s394_s1 + $0x38] sm:$0xff] }
   0x4   :  { %234 = vmatprep.subr.bf16.mxu0 %v233_v3  ;;  %230 = vmatprep.mubr.f32.mxu0 %v21_v9 }
   0x5   :  { %236 = vmatpush3.bf16.msra.mxu0 %v233_v3 }
   0x6   :  { %238 = vmatprep.subr.bf16.mxu0 %v237_v5 }
   0x7   :  { %8 = vsyncpa [#allocation4], 0  ;;  %v245_v12 = vpack.c.bf16 %v30_v11, %v29_v10  ;;  %v31_v13 = vld [vmem:[%s394_s1 + $0x40] sm:$0xff]  ;;  %v32_v14 = vld [vmem:[%s394_s1 + $0x48] sm:$0xff]  ;;  %vm19_vm0 = vcmask 74752   ;;  %v299_v26 = vmov 0.0  }
   0x8   :  { %v249_v15 = vpack.c.bf16 %v32_v14, %v31_v13  ;;  %v33_v16 = vld [vmem:[%s394_s1 + $0x50] sm:$0xff]  ;;  %v34_v17 = vld [vmem:[%s394_s1 + $0x58] sm:$0xff]  ;;  %v35_v19 = vld [vmem:[%s394_s1 + $0x60] sm:$0xff]  ;;  %20 = vst.msk [vmem:[#allocation2] sm:$0x3] %vm19_vm0, %v299_v26  ;;  %vm134_vm1 = vcmask 80896  }
   0x9   :  { %240 = vmatpush3.bf16.msra.mxu0 %v237_v5  ;;  %v253_v18 = vpack.c.bf16 %v34_v17, %v33_v16  ;;  %v36_v20 = vld [vmem:[%s394_s1 + $0x68] sm:$0xff]  ;;  %v37_v22 = vld [vmem:[%s394_s1 + $0x70] sm:$0xff]  ;;  %v38_v23 = vld [vmem:[%s394_s1 + $0x78] sm:$0xff]  ;;  %vm151_vm2 = vcmask 1041409  }
   0xa   :  { %242 = vmatprep.subr.bf16.mxu0 %v241_v8  ;;  %v257_v21 = vpack.c.bf16 %v36_v20, %v35_v19  ;;  %v261_v24 = vpack.c.bf16 %v38_v23, %v37_v22  ;;  %v22_v25 = vld [vmem:[%s393_s0 + $0x8] sm:$0xff]  ;;  %v177_v27 = vld [vmem:[%s395_s2] ss:$0 sm:$0xff]  ;;  %s300_s0 = smov [#allocation3]  }
   0xb   :  { %s169_s1 = sshll.u32 %s300_s0, 4  ;;  %s170_s1 = int_to_ptr.vmem [resolvable:$true] %s169_s1 }
   0xc   :  { %s275_s2 = scalar_lea.vmem %s170_s1, 32  ;;  %p280_p1 = scmp.lt.s32.totalorder %s170_s1, %s170_s1 }
   0xd   :  { %244 = vmatpush3.bf16.msra.mxu0 %v241_v8  ;;  %p276_p0 = scmp.ne.s32.totalorder %s170_s1, %s275_s2  ;;  %p281_p2 = scmp.lt.s32.totalorder %s275_s2, %s275_s2 }
   0xe   :  { %246 = vmatprep.subr.bf16.mxu0 %v245_v12 }
   0xf   :  { %v133_v53 = vld [vmem:[#allocation2] sm:$0x3]  ;;  %p282_p3 = por %p281_p2, %p280_p1 }
  0x11   :  { %248 = vmatpush3.bf16.msra.mxu0 %v245_v12  ;;  %p283_p4 = pnand %p282_p3, %p276_p0 }
  0x12   :  { %250 = vmatprep.subr.bf16.mxu0 %v249_v15 }
  0x15   :  { %252 = vmatpush3.bf16.msra.mxu0 %v249_v15 }
  0x16   :  { %254 = vmatprep.subr.bf16.mxu0 %v253_v18 }
  0x19   :  { %256 = vmatpush3.bf16.msra.mxu0 %v253_v18 }
  0x1a   :  { %258 = vmatprep.subr.bf16.mxu0 %v257_v21 }
  0x1d   :  { %260 = vmatpush3.bf16.msra.mxu0 %v257_v21 }
  0x1e   :  { %262 = vmatprep.subr.bf16.mxu0 %v261_v24 }
  0x21   :  { %264 = vmatpush3.bf16.msra.mxu0 %v261_v24 }
  0x24   :  { %231 = vmatmul.mubr.f32.vlgmr.msra.gmra.mrb[0].mxu0 %v22_v25 }
  0xf7   :  { %v232_v28 = vpop.f32.mrb[0].mxu0 }
  0xf8   :  { %v118_v29 = vadd.f32 %v232_v28, %v177_v27  ;;  %v112_v30 = vpop.f32.mrb[1].mxu0 }
  0xf9   :  { %v113_v31 = vadd.f32 %v177_v27, %v112_v30 }
  0xfa   :  { %v179_v32 = vmul.f32 -1.442695, %v118_v29 }
  0xfb   :  { %v178_v33 = vmul.f32 -1.442695, %v113_v31 }
  0xfc   :  { %267 = vpow2.f32 %v179_v32 }
  0xfd   :  { %269 = vpow2.f32 %v178_v33 }
 0x106   :  { %v268_v34 = vpop.eup %267 }
 0x107   :  { %v270_v35 = vpop.eup %269  ;;  %v128_v36 = vadd.f32 1.0, %v268_v34 }
 0x108   :  { %v127_v37 = vadd.f32 1.0, %v270_v35 }
 0x109   :  { %271 = vrcp.f32 %v128_v36 }
 0x10a   :  { %273 = vrcp.f32 %v127_v37 }
 0x113   :  { %v272_v38 = vpop.eup %271 }
 0x114   :  { %v274_v39 = vpop.eup %273  ;;  %v142_v40 = vsel %vm134_vm1, %v272_v38, 0.0 }
 0x115   :  { %v143_v41 = vrot.slane %v142_v40, 4  ;;  %v135_v42 = vsel %vm134_vm1, %v274_v39, 0.0 }
 0x116   :  { %v136_v43 = vrot.slane %v135_v42, 4 }
 0x117   :  { %v144_v44 = vadd.f32 %v143_v41, %v142_v40 }
 0x118   :  { %v137_v45 = vadd.f32 %v136_v43, %v135_v42 }
 0x119   :  { %v145_v46 = vrot.slane %v144_v44, 2 }
 0x11a   :  { %v138_v47 = vrot.slane %v137_v45, 2 }
 0x11b   :  { %v146_v48 = vadd.f32 %v145_v46, %v144_v44 }
 0x11c   :  { %v139_v49 = vadd.f32 %v138_v47, %v137_v45 }
 0x11d   :  { %v147_v50 = vrot.slane %v146_v48, 1 }
 0x11e   :  { %v140_v51 = vrot.slane %v139_v49, 1 }
 0x11f   :  { %v148_v52 = vadd.f32 %v147_v50, %v146_v48 }
 0x120   :  { %v141_v54 = vadd.f32 %v140_v51, %v139_v49 }
 0x122   :  { %v152_v55 = vsel %vm151_vm2, %v148_v52, %v141_v54 }
 0x123   :  { %v154_v56 = vadd.f32 %v152_v55, %v133_v53 }
 0x125   :  { %156 = vst.msk [vmem:[#allocation2] sm:$0x3] %vm19_vm0, %v154_v56 }
 0x12c   :  { %v160_v57 = vld [vmem:[#allocation2] sm:$0x3] }
 0x12d   :  { %v161_v58 = vmul.f32 0.125, %v160_v57 }
 0x12f   :  { %162 = vst.msk [vmem:[#allocation3] sm:$0x3] %vm19_vm0, %v161_v58 }
 0x130   :  { %286 = shalt.err (!%p283_p4)
}
 0x131   :  { %s287_s25 = scalar_lea.hbm %s396_s3, 32 }
 0x132   :  { %p288_p5 = scmp.ne.s32.totalorder %s396_s3, %s287_s25  ;;  %p291_p6 = scmp.lt.u32.totalorder %s287_s25, %s396_s3 }
 0x134   :  { %p293_p7 = pnand %p291_p6, %p288_p5 }
 0x136   :  { %296 = shalt.err (!%p293_p7)
}
 0x137   :  { %172 = dma.vmem_to_hbm [thread:$0]  %s170_s1, 32, %s396_s3, [#allocation4]  }
 0x138   :  { %297 = dma.done.wait [#allocation4], 32  }
 0x139   :  { %298 = vsyncadd [#allocation4], 4294967264 }
 0x13a   :  { %176 = vsyncpa [#allocation4], 1 }

</bundles_post_ra>
